<compile_context>
chip_gen: v7x
topology: tpu7x:2x2x1
jax: 0.10.0
libtpu: 0.0.40
codegen_flags: <defaults>
</compile_context>

<pallas_src>
import numpy as np
import jax
import jax.numpy as jnp
from jax import lax
from jax.experimental import pallas as pl
from jax.experimental.pallas import tpu as pltpu

# --- constants from the reference module -------------------------------------
N_VARYING = 21                        # len(name_varying)
PARAM_HIDDEN = 128
PARAM_SHRINKAGE = 8
EMB_DIM = PARAM_HIDDEN // PARAM_SHRINKAGE      # 16
N_PAD = 24                            # pad 21 -> 24 so out lanes = 24*16 = 384 = 3*128
OUT_LANES = N_PAD * EMB_DIM           # 384
T_BLK = 1024                          # packed-row tile (sweepable 512-2048)


def _round_up(x, m):
    return int((x + m - 1) // m) * m


# layout:
#   xp_ref  : (T_BLK, 24)       f32  packed rows (3 padded zero columns)
#   m_ref   : (24, 384)         f32  block-diagonal weights, M[n, n*16+h] = W[n, h]
#   b_ref   : (1, 384)          f32  flat bias
#   out_ref : (T_BLK, 384)      f32  lane-dense output slab
def _embed_varying_kernel(xp_ref, m_ref, b_ref, out_ref):
    out_ref[...] = (
        jnp.dot(xp_ref[...], m_ref[...],
                preferred_element_type=jnp.float32,
                precision=lax.Precision.HIGHEST)   # exact: one nonzero product/lane
        + b_ref[...]
    )


def _make_flat_params(W, b):
    """W, b: (21, 16) -> block-diagonal M (24, 384) and flat bias (1, 384)."""
    W = np.asarray(W, np.float32)
    b = np.asarray(b, np.float32)
    M = np.zeros((N_PAD, OUT_LANES), np.float32)
    for n in range(N_VARYING):
        M[n, n * EMB_DIM:(n + 1) * EMB_DIM] = W[n]
    b_flat = np.zeros((1, OUT_LANES), np.float32)
    b_flat[0, :N_VARYING * EMB_DIM] = b.reshape(-1)
    return jnp.asarray(M), jnp.asarray(b_flat)


def embedding_varying_pallas(xp, M, b_flat, *, t_blk=T_BLK):
    """xp: (T, 21) f32 packed rows.  Returns padded lane-dense (T_pad, 384) f32.

    Row t, lanes [n*16:(n+1)*16] hold the embedding of varying column n (n<21).
    Padded rows (t >= T) and padded columns (n >= 21) are don't-care.
    """
    T = xp.shape[0]
    t_blk = min(t_blk, _round_up(T, 8))            # keep sublane alignment, avoid huge pad
    T_pad = _round_up(T, t_blk)
    xp_p = jnp.pad(xp.astype(jnp.float32),
                   ((0, T_pad - T), (0, N_PAD - N_VARYING)))

    return pl.pallas_call(
        _embed_varying_kernel,
        out_shape=jax.ShapeDtypeStruct((T_pad, OUT_LANES), jnp.float32),
        grid_spec=pltpu.PrefetchScalarGridSpec(
            num_scalar_prefetch=0,
            grid=(T_pad // t_blk,),
            in_specs=[
                pl.BlockSpec((t_blk, N_PAD), lambda i: (i, 0)),
                pl.BlockSpec((N_PAD, OUT_LANES), lambda i: (0, 0)),
                pl.BlockSpec((1, OUT_LANES), lambda i: (0, 0)),
            ],
            out_specs=pl.BlockSpec((t_blk, OUT_LANES), lambda i: (i, 0)),
        ),
        compiler_params=pltpu.CompilerParams(
            dimension_semantics=("parallel",)),     # megacore sharding on v7x
    )(xp_p, M, b_flat)


# --- glue: pack_padded_sequence(batch_first=True, enforce_sorted=False) ------
def sequence_to_pack(x, lengths):
    """x: (B, S, C), lengths: ints. Returns packed data (T_total, C) f32.

    Vectorized (no Python per-row loop): sort by length desc, then emit rows
    time-major / sorted-batch-minor, matching torch's packed data ordering.
    """
    x = np.asarray(x)
    lengths = np.asarray(lengths)
    order = np.argsort(-lengths, kind="stable")
    x_sorted = x[order]                              # (B, S, C)
    lens_sorted = lengths[order]
    S = int(lengths.max())
    mask = np.arange(S)[:, None] < lens_sorted[None, :]     # (S, B)
    x_ts = np.transpose(x_sorted[:, :S], (1, 0, 2))         # (S, B, C)
    packed = x_ts[mask]                                     # (T_total, C)
    return jnp.asarray(packed, dtype=jnp.float32)


if __name__ == "__main__":
    key = jax.random.PRNGKey(0)
    k_x, k_w, k_b = jax.random.split(key, 3)

    # small shapes: batch=3, seq=8, n_varying=21
    B, S = 3, 8
    x = jax.random.normal(k_x, (B, S, N_VARYING), dtype=jnp.float32)
    lengths = [8, 5, 3]

    # deterministic synthetic parameters: one Linear(1, 16) per varying column
    W = jax.random.normal(k_w, (N_VARYING, EMB_DIM), dtype=jnp.float32) * 0.1
    b = jax.random.normal(k_b, (N_VARYING, EMB_DIM), dtype=jnp.float32) * 0.1

    xp = sequence_to_pack(x, lengths)                 # (T_total, 21)
    M, b_flat = _make_flat_params(W, b)               # (24, 384), (1, 384)

    out_flat = embedding_varying_pallas(xp, M, b_flat)   # (T_pad, 384) lane-dense
    out_flat = jax.block_until_ready(out_flat)

    # verification only: unpack padded slab back to module-shaped (T, 21, 16)
    T = xp.shape[0]
    out = np.asarray(out_flat)[:T, :N_VARYING * EMB_DIM].reshape(T, N_VARYING, EMB_DIM)
    ref = np.asarray(xp)[:, :, None] * np.asarray(W)[None, :, :] + np.asarray(b)[None, :, :]

    assert out.shape == (int(np.sum(lengths)), N_VARYING, EMB_DIM)
    assert np.allclose(out, ref, atol=1e-5, rtol=1e-5)

    print("KERNEL_OK")
</pallas_src>

<mosaic_0001>
module attributes {stable_mosaic.version = 11 : i64} {
  func.func @_embed_varying_kernel(%arg0: i32, %arg1: memref<16x24xf32, #tpu.memory_space<vmem>>, %arg2: memref<24x384xf32, #tpu.memory_space<vmem>>, %arg3: memref<1x384xf32, #tpu.memory_space<vmem>>, %arg4: memref<16x384xf32, #tpu.memory_space<vmem>>) attributes {dimension_semantics = [#tpu.dimension_semantics<parallel>], iteration_bounds = array<i64: 1>, scalar_prefetch = 0 : i64, scratch_operands = 0 : i64, tpu.core_type = #tpu.core_type<tc>, window_params = [{transform_indices = @transform_0, window_bounds = array<i64: 16, 24>}, {pipeline_mode = #tpu.pipeline_mode<synchronous>, transform_indices = @transform_1, window_bounds = array<i64: 24, 384>}, {pipeline_mode = #tpu.pipeline_mode<synchronous>, transform_indices = @transform_2, window_bounds = array<i64: 1, 384>}, {transform_indices = @transform_3, window_bounds = array<i64: 16, 384>}]} {
    %c0 = arith.constant 0 : index
    %c0_0 = arith.constant 0 : index
    %0 = vector.load %arg1[%c0, %c0_0] : memref<16x24xf32, #tpu.memory_space<vmem>>, vector<16x24xf32>
    %c0_1 = arith.constant 0 : index
    %c0_2 = arith.constant 0 : index
    %1 = vector.load %arg2[%c0_1, %c0_2] : memref<24x384xf32, #tpu.memory_space<vmem>>, vector<24x384xf32>
    %cst = arith.constant dense<0.000000e+00> : vector<16x384xf32>
    %2 = tpu.matmul %0, %1, %cst {dimension_numbers = #tpu.dot_dimension_numbers<[1], [0], [0], [1], [0, 0, 1, 1], [], []>, precision = #tpu.contract_precision<fp32>} : vector<16x24xf32>, vector<24x384xf32>, vector<16x384xf32> -> vector<16x384xf32>
    %c0_3 = arith.constant 0 : index
    %c0_4 = arith.constant 0 : index
    %3 = vector.load %arg3[%c0_3, %c0_4] : memref<1x384xf32, #tpu.memory_space<vmem>>, vector<1x384xf32>
    %4 = vector.broadcast %3 : vector<1x384xf32> to vector<16x384xf32>
    %5 = arith.addf %2, %4 : vector<16x384xf32>
    %c0_5 = arith.constant 0 : index
    %c0_6 = arith.constant 0 : index
    %6 = vector.load %arg4[%c0_5, %c0_6] : memref<16x384xf32, #tpu.memory_space<vmem>>, vector<16x384xf32>
    tpu.vector_store %arg4[%c0_5, %c0_6], %5 {strides = array<i32>} : memref<16x384xf32, #tpu.memory_space<vmem>>, vector<16x384xf32>,
    return
  }
  func.func @transform_0(%arg0: i32) -> (i32, i32) {
    %c0_i32 = arith.constant 0 : i32
    %c0_i32_0 = arith.constant 0 : i32
    return %arg0, %c0_i32 : i32, i32
  }
  func.func @transform_1(%arg0: i32) -> (i32, i32) {
    %c0_i32 = arith.constant 0 : i32
    %c0_i32_0 = arith.constant 0 : i32
    %c0_i32_1 = arith.constant 0 : i32
    return %c0_i32, %c0_i32_0 : i32, i32
  }
  func.func @transform_2(%arg0: i32) -> (i32, i32) {
    %c0_i32 = arith.constant 0 : i32
    %c0_i32_0 = arith.constant 0 : i32
    %c0_i32_1 = arith.constant 0 : i32
    return %c0_i32, %c0_i32_0 : i32, i32
  }
  func.func @transform_3(%arg0: i32) -> (i32, i32) {
    %c0_i32 = arith.constant 0 : i32
    %c0_i32_0 = arith.constant 0 : i32
    return %arg0, %c0_i32 : i32, i32
  }
}

</mosaic_0001>

<bundles_post_ra>
// kernel: tpu_custom_call.1
= control target key start
LH: loop header
LB: loop body
LE: loop exit
PB: predicated region body
PF: predicated region fallthrough
CT: control target
= control target key end

     0   :  { %8 = vsyncpa [#allocation3], 0  ;;  %s1674_s0 = inlined_call_operand.hbm [shape: f32[16,24], index: 0, kind: input, shape index: {}]   ;;  %s1675_s1 = inlined_call_operand.hbm [shape: f32[24,384], index: 1, kind: input, shape index: {}]   ;;  %s1676_s2 = inlined_call_operand.vmem [shape: f32[1,384], index: 2, kind: input, shape index: {}]   ;;  %s1677_s3 = inlined_call_operand.hbm [shape: f32[16,384], index: 3, kind: output, shape index: {}]  }
   0x1   :  { %9 = vsyncpa [#allocation6], 0 }
   0x2   :  { %10 = vsyncpa [#allocation4], 0  ;;  %s1431_s12 = smov [#allocation2]   ;;  %s1359_s16 = scalar_lea.hbm %s1674_s0, 256 }
   0x3   :  { %s16_s13 = sshll.u32 %s1431_s12, 4  ;;  %p1360_p0 = scmp.ne.s32.totalorder %s1674_s0, %s1359_s16  ;;  %s17_s13 = int_to_ptr.vmem [resolvable:$true] %s16_s13 }
   0x4   :  { %p1363_p1 = scmp.lt.u32.totalorder %s1359_s16, %s1674_s0 }
   0x6   :  { %p1365_p2 = pnand %p1363_p1, %p1360_p0 }
   0x8   :  { %1368 = shalt.err (!%p1365_p2)
}
   0x9   :  { %s1369_s21 = scalar_lea.vmem %s17_s13, 256  ;;  %p1374_p4 = scmp.lt.s32.totalorder %s17_s13, %s17_s13 }
   0xa   :  { %p1370_p3 = scmp.ne.s32.totalorder %s17_s13, %s1369_s21  ;;  %p1375_p5 = scmp.lt.s32.totalorder %s1369_s21, %s1369_s21 }
   0xc   :  { %p1376_p6 = por %p1375_p5, %p1374_p4 }
   0xe   :  { %p1377_p7 = pnand %p1376_p6, %p1370_p3 }
  0x10   :  { %1380 = shalt.err (!%p1377_p7)
}
  0x11   :  { %s1432_s22 = smov 128   ;;  %s1433_s23 = smov 8  }
  0x12   :  { %22 = dma.hbm_to_vmem [thread:$0]  %s1674_s0, 256, %s17_s13, [#allocation3], %s1432_s22, %s1432_s22, %s1433_s23  }
  0x13   :  { %s1434_s26 = smov [#allocation5]   ;;  %s1381_s30 = scalar_lea.hbm %s1675_s1, 1152 }
  0x14   :  { %s28_s27 = sshll.u32 %s1434_s26, 4  ;;  %p1382_p8 = scmp.ne.s32.totalorder %s1675_s1, %s1381_s30  ;;  %s29_s27 = int_to_ptr.vmem [resolvable:$true] %s28_s27 }
  0x15   :  { %p1385_p9 = scmp.lt.u32.totalorder %s1381_s30, %s1675_s1 }
  0x17   :  { %p1387_p10 = pnand %p1385_p9, %p1382_p8 }
  0x19   :  { %1390 = shalt.err (!%p1387_p10)
}
  0x1a   :  { %s1391_s8 = scalar_lea.vmem %s29_s27, 1152  ;;  %p1396_p12 = scmp.lt.s32.totalorder %s29_s27, %s29_s27 }
  0x1b   :  { %p1392_p11 = scmp.ne.s32.totalorder %s29_s27, %s1391_s8  ;;  %p1397_p13 = scmp.lt.s32.totalorder %s1391_s8, %s1391_s8 }
  0x1d   :  { %p1398_p0 = por %p1397_p13, %p1396_p12 }
  0x1f   :  { %p1399_p1 = pnand %p1398_p0, %p1392_p11 }
  0x21   :  { %1402 = shalt.err (!%p1399_p1)
}
  0x22   :  { %s1435_s0 = smov 384   ;;  %s1436_s9 = smov 24  }
  0x23   :  { %34 = dma.hbm_to_vmem [thread:$0]  %s1675_s1, 1152, %s29_s27, [#allocation6], %s1435_s0, %s1435_s0, %s1436_s9  }
  0x24   :  { %1425 = dma.done.wait [#allocation3], 256  }
  0x25   :  { %1426 = vsyncadd [#allocation3], 4294967040 }
  0x26   :  { %1427 = dma.done.wait [#allocation6], 1152  }
  0x27   :  { %1428 = vsyncadd [#allocation6], 4294966144  ;;  %v1437_v0 = vmov 0.0   ;;  %v46_v1 = vld [vmem:[#allocation5 + $0x8] sm:$0xff]  ;;  %v49_v2 = vld [vmem:[#allocation5 + $0x20] sm:$0xff]  ;;  %vm71_vm0 = vcmask 195584  }
  0x28   :  { %148 = vmatprep.mubr.f32.mxu1 %v1437_v0  ;;  %265 = vmatprep.mubr.f32.mxu0 %v1437_v0  ;;  %v45_v3 = vld [vmem:[#allocation5] sm:$0xff]  ;;  %v78_v4 = vand.u32 4294901760, %v46_v1  ;;  %v82_v5 = vand.u32 4294901760, %v49_v2  ;;  %v48_v6 = vld [vmem:[#allocation5 + $0x18] sm:$0xff]  ;;  %v51_v9 = vld [vmem:[#allocation5 + $0x30] sm:$0xff] }
  0x29   :  { %v80_v7 = vand.u32 4294901760, %v45_v3  ;;  %v52_v8 = vld [vmem:[#allocation5 + $0x38] sm:$0xff]  ;;  %v84_v10 = vand.u32 4294901760, %v48_v6  ;;  %v1490_v12 = vand.u32 4294901760, %v51_v9  ;;  %v47_v13 = vld [vmem:[#allocation5 + $0x10] sm:$0xff]  ;;  %v50_v14 = vld [vmem:[#allocation5 + $0x28] sm:$0xff] }
  0x2a   :  { %v1488_v11 = vand.u32 4294901760, %v52_v8  ;;  %v43_v15 = vld [vmem:[#allocation2] sm:$0xff]  ;;  %v1492_v16 = vpack.c.bf16 %v82_v5, %v78_v4  ;;  %v645_v18 = vand.u32 4294901760, %v47_v13  ;;  %v648_v19 = vand.u32 4294901760, %v50_v14  ;;  %v53_v20 = vld [vmem:[#allocation5 + $0x40] sm:$0xff]  ;;  %v44_v21 = vld [vmem:[#allocation2 + $0x8] sm:$0xff] }
  0x2b   :  { %v1494_v17 = vsub.f32 %v45_v3, %v80_v7  ;;  %v1496_v22 = vpack.c.bf16 %v84_v10, %v80_v7  ;;  %v1498_v23 = vsub.f32 %v48_v6, %v84_v10  ;;  %v73_v24 = vsel %vm71_vm0, %v43_v15, 0 }
  0x2c   :  { %v1501_v25 = vsub.f32 %v46_v1, %v78_v4  ;;  %1268 = vmatprep.subr.bf16.mxu1 %v1492_v16  ;;  %v1504_v26 = vpack.c.bf16 %v648_v19, %v645_v18  ;;  %v1506_v27 = vand.u32 4294901760, %v73_v24  ;;  %v1508_v28 = vsub.f32 %v49_v2, %v82_v5 }
  0x2d   :  { %v179_v29 = vand.u32 4294901760, %v1494_v17  ;;  %1270 = vmatpush1.bf16.msra.mxu1 %v1496_v22  ;;  %v191_v31 = vand.u32 4294901760, %v1498_v23  ;;  %v1514_v32 = vand.u32 4294901760, %v53_v20  ;;  %v76_v33 = vsel %vm71_vm0, %v44_v21, 0 }
  0x2e   :  { %v173_v30 = vand.u32 4294901760, %v1501_v25  ;;  %87 = vmatprep.subr.mxu1 %v1488_v11  ;;  %v1519_v34 = vsub.f32 %v73_v24, %v1506_v27  ;;  %v185_v35 = vand.u32 4294901760, %v1508_v28  ;;  %v1525_v37 = vand.u32 4294901760, %v76_v33  ;;  %v54_v24 = vld [vmem:[%s1676_s2] sm:$0x7]  ;;  %s1438_s2 = smov [#allocation7]  }
  0x2f   :  { %v180_v36 = vsub.f32 %v1494_v17, %v179_v29  ;;  %v192_v39 = vsub.f32 %v1498_v23, %v191_v31  ;;  %v1534_v40 = vsub.f32 %v52_v8, %v1488_v11  ;;  %v1537_v41 = vsub.f32 %v51_v9, %v1490_v12  ;;  %s1170_s13 = sshll.u32 %s1438_s2, 4  ;;  %s1171_s13 = int_to_ptr.vmem [resolvable:$true] %s1170_s13 }
  0x30   :  { %v174_v38 = vsub.f32 %v1501_v25, %v173_v30  ;;  %v1540_v42 = vand.u32 4294901760, %v1519_v34  ;;  %v186_v43 = vsub.f32 %v1508_v28, %v185_v35  ;;  %v1546_v45 = vsub.f32 %v76_v33, %v1525_v37  ;;  %s1403_s14 = scalar_lea.vmem %s1171_s13, 768  ;;  %p1408_p3 = scmp.lt.s32.totalorder %s1171_s13, %s1171_s13 }
  0x31   :  { %v181_v44 = vand.u32 4294901760, %v180_v36  ;;  %89 = vmatpush1.msra.mxu1 %v1490_v12  ;;  %v193_v47 = vand.u32 4294901760, %v192_v39  ;;  %v197_v48 = vand.u32 4294901760, %v1534_v40  ;;  %v203_v49 = vand.u32 4294901760, %v1537_v41  ;;  %p1404_p2 = scmp.ne.s32.totalorder %s1171_s13, %s1403_s14  ;;  %p1409_p4 = scmp.lt.s32.totalorder %s1403_s14, %s1403_s14 }
  0x32   :  { %v175_v46 = vand.u32 4294901760, %v174_v38  ;;  %1292 = vmatprep.subr.bf16.mxu1 %v1504_v26  ;;  %v152_v50 = vsub.f32 %v1519_v34, %v1540_v42  ;;  %v187_v51 = vand.u32 4294901760, %v186_v43  ;;  %v1555_v52 = vand.u32 4294901760, %v1546_v45 }
  0x33   :  { %v1557_v53 = vsub.f32 %v47_v13, %v645_v18  ;;  %v1273_v54 = vpack.c.bf16 %v193_v47, %v181_v44  ;;  %v198_v55 = vsub.f32 %v1534_v40, %v197_v48  ;;  %v204_v56 = vsub.f32 %v1537_v41, %v203_v49  ;;  %p1410_p5 = por %p1409_p4, %p1408_p3 }
  0x34   :  { %v1565_v57 = vsub.f32 %v50_v14, %v648_v19  ;;  %v153_v58 = vand.u32 4294901760, %v152_v50  ;;  %v1271_v59 = vpack.c.bf16 %v187_v51, %v175_v46  ;;  %v163_v60 = vsub.f32 %v1546_v45, %v1555_v52 }
  0x35   :  { %v735_v61 = vand.u32 4294901760, %v1557_v53  ;;  %v199_v62 = vand.u32 4294901760, %v198_v55  ;;  %v748_v3 = vsub.f32 %v53_v20, %v1514_v32  ;;  %v205_v4 = vand.u32 4294901760, %v204_v56  ;;  %p1411_p6 = pnand %p1410_p5, %p1404_p2 }
  0x36   :  { %v742_v63 = vand.u32 4294901760, %v1565_v57  ;;  %154 = vmatmul.mubr.f32.vlgmr.msra.gmra.mrb[0].mxu1 %v153_v58  ;;  %1272 = vmatprep.subr.bf16.mxu0 %v1271_v59  ;;  %v164_v1 = vand.u32 4294901760, %v163_v60  ;;  %v1275_v9 = vpack.c.bf16 %v1508_v28, %v1501_v25  ;;  %v1277_v14 = vpack.c.bf16 %v1498_v23, %v1494_v17 }
  0x37   :  { %v736_v2 = vsub.f32 %v1557_v53, %v735_v61  ;;  %1294 = vmatpush3.bf16.msra.mxu1 %v1504_v26  ;;  %1274 = vmatpush1.bf16.msra.mxu0 %v1273_v54  ;;  %v1581_v7 = vand.u32 4294901760, %v748_v3  ;;  %v1299_v18 = vpack.c.bf16 %v1565_v57, %v1557_v53  ;;  %v1283_v19 = vpack.c.bf16 %v185_v35, %v173_v30 }
  0x38   :  { %v743_v5 = vsub.f32 %v1565_v57, %v742_v63  ;;  %159 = vmatprep.mubr.f32.mxu1 %v1437_v0  ;;  %1217 = vmatprep.subr.mxu1 %v1514_v32  ;;  %v1285_v20 = vpack.c.bf16 %v191_v31, %v179_v29  ;;  %v1307_v17 = vpack.c.bf16 %v742_v63, %v735_v61 }
  0x39   :  { %v737_v6 = vand.u32 4294901760, %v736_v2  ;;  %200 = vmatprep.subr.mxu0 %v199_v62  ;;  %v750_v10 = vsub.f32 %v748_v3, %v1581_v7 }
  0x3a   :  { %v744_v8 = vand.u32 4294901760, %v743_v5  ;;  %165 = vmatmul.mubr.f32.gmra.mrb[2].mxu1 %v164_v1 }
  0x3b   :  { %1218 = vmatpush3.msra.mxu1 %v1514_v32  ;;  %206 = vmatpush1.msra.mxu0 %v205_v4  ;;  %v751_v15 = vand.u32 4294901760, %v750_v10 }
  0x3c   :  { %v1295_v13 = vpack.c.bf16 %v744_v8, %v737_v6  ;;  %267 = vmatmul.mubr.f32.vlgmr.msra.gmra.mrb[0].mxu0 %v1506_v27  ;;  %1219 = vmatprep.mubr.f32.mxu1 %v153_v58 }
  0x3d   :  { %1276 = vmatprep.subr.bf16.mxu0 %v1275_v9  ;;  %272 = vmatprep.mubr.f32.mxu0 %v1437_v0 }
  0x3e   :  { %1296 = vmatprep.subr.bf16.mxu1 %v1295_v13  ;;  %1220 = vmatmul.mubr.f32.vlgmr.msra.gmra.mrb[4].mxu1 %v164_v1 }
  0x3f   :  { %1298 = vmatpush3.bf16.msra.mxu1 %v1295_v13  ;;  %1278 = vmatpush1.bf16.msra.mxu0 %v1277_v14 }
  0x40   :  { %274 = vmatmul.mubr.f32.gmra.mrb[2].mxu0 %v1525_v37  ;;  %1226 = vmatprep.subr.mxu1 %v751_v15 }
  0x41   :  { %294 = vmatprep.subr.mxu0 %v1534_v40  ;;  %356 = vmatprep.mubr.f32.mxu0 %v1437_v0 }
  0x42   :  { %1228 = vmatprep.mubr.f32.mxu1 %v1506_v27 }
  0x43   :  { %1227 = vmatpush3.msra.mxu1 %v751_v15  ;;  %297 = vmatpush1.msra.mxu0 %v1537_v41 }
  0x44   :  { %359 = vmatmul.mubr.f32.vlgmr.msra.gmra.mrb[0].mxu0 %v1519_v34  ;;  %1300 = vmatprep.subr.bf16.mxu1 %v1299_v18 }
  0x45   :  { %1280 = vmatprep.subr.bf16.mxu0 %v1492_v16  ;;  %364 = vmatprep.mubr.f32.mxu0 %v1437_v0 }
  0x46   :  { %1229 = vmatmul.mubr.f32.vlgmr.msra.gmra.mrb[4].mxu1 %v1525_v37  ;;  %1282 = vmatpush1.bf16.msra.mxu0 %v1496_v22 }
  0x47   :  { %1302 = vmatpush3.bf16.msra.mxu1 %v1299_v18  ;;  %382 = vmatprep.subr.mxu0 %v1488_v11 }
  0x48   :  { %367 = vmatmul.mubr.f32.gmra.mrb[2].mxu0 %v1546_v45  ;;  %1235 = vmatprep.subr.mxu1 %v748_v3 }
  0x49   :  { %443 = vmatprep.mubr.f32.mxu0 %v1437_v0  ;;  %1237 = vmatprep.mubr.f32.mxu1 %v1519_v34 }
  0x4a   :  { %384 = vmatpush1.msra.mxu0 %v1490_v12 }
  0x4b   :  { %1236 = vmatpush3.msra.mxu1 %v748_v3  ;;  %1284 = vmatprep.subr.bf16.mxu0 %v1283_v19 }
  0x4c   :  { %447 = vmatmul.mubr.f32.vlgmr.msra.gmra.mrb[0].mxu0 %v1540_v42  ;;  %1304 = vmatprep.subr.bf16.mxu1 %v1504_v26 }
  0x4d   :  { %452 = vmatprep.mubr.f32.mxu0 %v1437_v0  ;;  %1286 = vmatpush1.bf16.msra.mxu0 %v1285_v20 }
  0x4e   :  { %1238 = vmatmul.mubr.f32.vlgmr.msra.gmra.mrb[4].mxu1 %v1546_v45  ;;  %481 = vmatprep.subr.mxu0 %v197_v48 }
  0x4f   :  { %1306 = vmatpush3.bf16.msra.mxu1 %v1504_v26  ;;  %1246 = vmatprep.mubr.f32.mxu1 %v1540_v42 }
  0x50   :  { %456 = vmatmul.mubr.f32.gmra.mrb[2].mxu0 %v1555_v52  ;;  %1244 = vmatprep.subr.mxu1 %v1514_v32 }
  0x51   :  { %485 = vmatpush1.msra.mxu0 %v203_v49  ;;  %544 = vmatprep.mubr.f32.mxu0 %v1437_v0 }
  0x52   :  { %1288 = vmatprep.subr.bf16.mxu0 %v1492_v16 }
  0x53   :  { %1245 = vmatpush3.msra.mxu1 %v1514_v32 }
  0x54   :  { %546 = vmatmul.mubr.f32.vlgmr.msra.gmra.mrb[0].mxu0 %v1506_v27  ;;  %1308 = vmatprep.subr.bf16.mxu1 %v1307_v17 }
  0x55   :  { %551 = vmatprep.mubr.f32.mxu0 %v1437_v0  ;;  %1290 = vmatpush1.bf16.msra.mxu0 %v1496_v22  ;;  %v56_v22 = vlaneseq }
  0x56   :  { %1247 = vmatmul.mubr.f32.vlgmr.msra.gmra.mrb[4].mxu1 %v1555_v52  ;;  %568 = vmatprep.subr.mxu0 %v1488_v11 }
  0x57   :  { %1310 = vmatpush3.bf16.msra.mxu1 %v1307_v17  ;;  %1255 = vmatprep.mubr.f32.mxu1 %v1506_v27 }
  0x58   :  { %553 = vmatmul.mubr.f32.gmra.mrb[2].mxu0 %v1525_v37  ;;  %1253 = vmatprep.subr.mxu1 %v1581_v7 }
  0x59   :  { %570 = vmatpush1.msra.mxu0 %v1490_v12  ;;  %629 = vmatprep.mubr.f32.mxu0 %v1437_v0 }
  0x5b   :  { %1254 = vmatpush3.msra.mxu1 %v1581_v7 }
  0x5c   :  { %631 = vmatmul.mubr.f32.vlgmr.msra.gmra.mrb[0].mxu0 %v1506_v27  ;;  %1312 = vmatprep.subr.bf16.mxu1 %v1504_v26 }
  0x5d   :  { %636 = vmatprep.mubr.f32.mxu0 %v1437_v0  ;;  %v57_v0 = vshrl.u32 %v56_v22, 7 }
  0x5e   :  { %1256 = vmatmul.mubr.f32.vlgmr.msra.gmra.mrb[4].mxu1 %v1525_v37 }
  0x5f   :  { %1314 = vmatpush3.bf16.msra.mxu1 %v1504_v26  ;;  %1264 = vmatprep.mubr.f32.mxu1 %v1506_v27  ;;  %v58_v23 = vsub.s32 0, %v57_v0  ;;  %v62_v25 = vsub.s32 1, %v57_v0  ;;  %v66_v35 = vsub.s32 2, %v57_v0 }
  0x60   :  { %638 = vmatmul.mubr.f32.gmra.mrb[2].mxu0 %v1525_v37  ;;  %1262 = vmatprep.subr.mxu1 %v1514_v32 }
  0x61   :  { %v59_v26 = vrot.slane %v54_v24, %v58_v23  ;;  %v63_v27 = vrot.slane %v54_v24, %v62_v25  ;;  %v67_v41 = vrot.slane %v54_v24, %v66_v35 }
  0x63   :  { %1263 = vmatpush3.msra.mxu1 %v1514_v32 }
  0x66   :  { %1265 = vmatmul.mubr.f32.vlgmr.msra.gmra.mrb[4].mxu1 %v1525_v37 }
 0x109   :  { %v155_v11 = vpop.f32.mrb[0].mxu1 }
 0x10a   :  { %v157_v12 = vpop.f32.mrb[1].mxu1  ;;  %v156_v28 = vadd.f32 %v155_v11, %v59_v26 }
 0x10b   :  { %v158_v29 = vadd.f32 %v157_v12, %v63_v27 }
 0x10d   :  { %v166_v16 = vpop.f32.mrb[2].mxu1 }
 0x10e   :  { %v168_v21 = vpop.f32.mrb[3].mxu1  ;;  %v167_v34 = vadd.f32 %v166_v16, %v59_v26 }
 0x10f   :  { %v169_v36 = vadd.f32 %v168_v21, %v63_v27 }
 0x12f   :  { %v632_v30 = vpop.f32.mrb[0].mxu0 }
 0x130   :  { %v1316_v31 = vadd.f32 %v632_v30, %v156_v28  ;;  %v634_v32 = vpop.f32.mrb[1].mxu0 }
 0x131   :  { %v1318_v33 = vadd.f32 %v634_v32, %v158_v29 }
 0x132   :  { %1159 = vst [vmem:[#allocation7] sm:$0xff] %v1316_v31 }
 0x133   :  { %1160 = vst [vmem:[#allocation7 + $0x8] sm:$0xff] %v1318_v33  ;;  %v639_v37 = vpop.f32.mrb[2].mxu0 }
 0x134   :  { %v1320_v38 = vadd.f32 %v639_v37, %v167_v34  ;;  %v641_v39 = vpop.f32.mrb[3].mxu0 }
 0x135   :  { %v1322_v40 = vadd.f32 %v641_v39, %v169_v36 }
 0x136   :  { %1162 = vst [vmem:[#allocation7 + $0x18] sm:$0xff] %v1320_v38 }
 0x137   :  { %1163 = vst [vmem:[#allocation7 + $0x20] sm:$0xff] %v1322_v40 }
 0x139   :  { %v1266_v42 = vpop.f32.mrb[4].mxu1 }
 0x13a   :  { %v1323_v43 = vadd.f32 %v1266_v42, %v67_v41  ;;  %v1149_v44 = vpop.f32.mrb[5].mxu1 }
 0x13b   :  { %v1324_v45 = vadd.f32 %v1149_v44, %v67_v41 }
 0x13c   :  { %1164 = vst [vmem:[#allocation7 + $0x28] sm:$0xff] %v1323_v43 }
 0x13d   :  { %1161 = vst [vmem:[#allocation7 + $0x10] sm:$0xff] %v1324_v45 }
 0x13e   :  { %1414 = shalt.err (!%p1411_p6)
}
 0x13f   :  { %s1415_s17 = scalar_lea.hbm %s1677_s3, 768 }
 0x140   :  { %p1416_p7 = scmp.ne.s32.totalorder %s1677_s3, %s1415_s17  ;;  %p1419_p8 = scmp.lt.u32.totalorder %s1415_s17, %s1677_s3 }
 0x142   :  { %p1421_p9 = pnand %p1419_p8, %p1416_p7 }
 0x144   :  { %1424 = shalt.err (!%p1421_p9)
}
 0x145   :  { %1176 = dma.vmem_to_hbm [thread:$0]  %s1171_s13, 768, %s1677_s3, [#allocation4], %s1435_s0, %s1435_s0, %s1436_s9  }
 0x146   :  { %1429 = dma.done.wait [#allocation4], 768  }
 0x147   :  { %1430 = vsyncadd [#allocation4], 4294966528 }
 0x148   :  { %1180 = vsyncpa [#allocation3], 1 }
 0x149   :  { %1181 = vsyncpa [#allocation6], 1 }
 0x14a   :  { %1182 = vsyncpa [#allocation4], 1 }

</bundles_post_ra>
